<compile_context>
chip_gen: v6e
topology: v6e:2x2x1
jax: 0.10.0
libtpu: 0.0.40
codegen_flags: <defaults>
</compile_context>

<pallas_src>
import functools

import jax
import jax.numpy as jnp
from jax import lax
from jax.experimental import pallas as pl
from jax.experimental.pallas import tpu as pltpu


def _round_up(x, m):
    return ((x + m - 1) // m) * m


def _fused_attn_kernel(xv_ref, xl_ref, w1_ref, pv_ref, lw1_ref, plg_ref,
                       scal_ref, out_ref, *, final_relu):
    """One edge tile (TM edges) of both attention MLPs.

    xv_ref  : (TM, D1) visual edge features (HBM row-major block, no transpose)
    xl_ref  : (TM, D2) language edge features
    w1_ref  : (H1, D1) attn_fc layer-1 weight (PyTorch (out, in) layout)
    pv_ref  : (H1, 2)  packed [b1 | w2] for attn_fc
    lw1_ref : (H2, D2) attn_fc_lang layer-1 weight
    plg_ref : (H2, 2)  packed [lb1 | lw2] for attn_fc_lang
    scal_ref: (2,)     SMEM scalars [b2, lb2]
    out_ref : (2, TM)  row 0 = a_feat, row 1 = a_feat_lang (lane-dense)
    """
    # Contract both operands' last dims (A @ B^T): result has edges on lanes,
    # so no materialized transpose of x is ever needed.
    nt = (((1,), (1,)), ((), ()))

    # ---- visual branch: attn_fc(e_f) ----
    pv = pv_ref[...].astype(jnp.float32)                               # (H1, 2)
    h = lax.dot_general(w1_ref[...], xv_ref[...], nt,
                        preferred_element_type=jnp.float32)            # (H1, TM) MXU
    h = jnp.maximum(h + pv[:, 0:1], 0.0)                               # +b1, ReLU
    # H1 -> 1 layer: VPU multiply + XLU sublane reduce (no MXU round-trip).
    y = jnp.sum(h * pv[:, 1:2], axis=0, keepdims=True) + scal_ref[0]   # (1, TM)

    # ---- language branch: attn_fc_lang(e_f_lang) ----
    pg = plg_ref[...].astype(jnp.float32)                              # (H2, 2)
    hl = lax.dot_general(lw1_ref[...], xl_ref[...], nt,
                         preferred_element_type=jnp.float32)           # (H2, TM)
    hl = jnp.maximum(hl + pg[:, 0:1], 0.0)
    yl = jnp.sum(hl * pg[:, 1:2], axis=0, keepdims=True) + scal_ref[1]

    if final_relu:
        y = jnp.maximum(y, 0.0)
        yl = jnp.maximum(yl, 0.0)

    out_ref[...] = jnp.concatenate([y, yl], axis=0).astype(out_ref.dtype)


def e_attention_module1_forward(e_f, e_f_lang, attn_params, attn_lang_params,
                                *, tm_max=4096, final_relu=True):
    """Pallas equivalent of E_AttentionModule1.forward(edge).

    e_f:      (E, D1) edge visual features   (edge.data['e_f'])
    e_f_lang: (E, D2) edge language features (edge.data['e_f_lang'])
    *_params: [(w, b), (w, b)] in PyTorch Linear layout (w: (out, in), b: (out,))
    """
    E, D1 = e_f.shape
    E2, D2 = e_f_lang.shape
    assert E == E2, "e_f and e_f_lang must describe the same edges"
    (w1, b1), (w2, b2) = attn_params
    (lw1, lb1), (lw2, lb2) = attn_lang_params
    H1 = w1.shape[0]
    H2 = lw1.shape[0]
    dtype = e_f.dtype

    # Edge tiling: small E -> a single full block (block dims == array dims, no
    # divisibility constraint); large E -> tiles that are multiples of 128
    # (valid sublane/lane block sizes), at least 2 of them so the "parallel"
    # edge axis can be split across v7x's two TensorCores. The grid uses cdiv;
    # the ragged last block is masked by Pallas (edges are independent, so the
    # garbage rows it computes never reach the output).
    if E <= 2048:
        tm = E
    else:
        tm = min(int(tm_max), _round_up(-(-E // 2), 128))
    grid = (int(pl.cdiv(E, tm)),)

    # Pack the tiny parameters (fewer operands / DMA descriptors):
    #   pv[:, 0] = b1, pv[:, 1] = w2 ; plg likewise ; scal = [b2, lb2] in SMEM.
    pv = jnp.concatenate([b1.reshape(H1, 1), w2.reshape(H1, 1)],
                         axis=1).astype(jnp.float32)
    plg = jnp.concatenate([lb1.reshape(H2, 1), lw2.reshape(H2, 1)],
                          axis=1).astype(jnp.float32)
    scal = jnp.stack([b2.reshape(()), lb2.reshape(())]).astype(jnp.float32)

    def resident(shape):   # tiny weight block, same for every grid step
        return pl.BlockSpec(shape, lambda i: (0, 0))

    out = pl.pallas_call(
        functools.partial(_fused_attn_kernel, final_relu=final_relu),
        out_shape=jax.ShapeDtypeStruct((2, E), dtype),
        grid_spec=pl.GridSpec(
            grid=grid,
            in_specs=[
                pl.BlockSpec((tm, D1), lambda i: (i, 0)),   # e_f tile (HBM layout)
                pl.BlockSpec((tm, D2), lambda i: (i, 0)),   # e_f_lang tile
                resident((H1, D1)),                         # attn_fc W1
                resident((H1, 2)),                          # packed [b1 | w2]
                resident((H2, D2)),                         # attn_fc_lang W1
                resident((H2, 2)),                          # packed [lb1 | lw2]
                pl.BlockSpec(memory_space=pltpu.MemorySpace.SMEM),   # [b2, lb2]
            ],
            out_specs=pl.BlockSpec((2, tm), lambda i: (0, i)),  # lane-dense slab
        ),
        compiler_params=pltpu.CompilerParams(
            # parallel edge-tile axis -> megacore sharding on v7x for large E
            dimension_semantics=("parallel",),
        ),
    )(e_f, e_f_lang, w1.astype(dtype), pv, lw1.astype(dtype), plg, scal)

    a_feat = out[0].reshape(E, 1)
    a_feat_lang = out[1].reshape(E, 1)
    return {"a_feat": a_feat, "a_feat_lang": a_feat_lang}


def init_mlp_params(key, layer_sizes, dtype=jnp.float32):
    """PyTorch-Linear-style uniform(-1/sqrt(fan_in), 1/sqrt(fan_in)) init.

    Weights kept in PyTorch layout: w is (out_features, in_features), b is (out,).
    """
    params = []
    for fan_in, fan_out in zip(layer_sizes[:-1], layer_sizes[1:]):
        key, kw, kb = jax.random.split(key, 3)
        bound = 1.0 / (fan_in ** 0.5)
        w = jax.random.uniform(kw, (fan_out, fan_in), dtype, -bound, bound)
        b = jax.random.uniform(kb, (fan_out,), dtype, -bound, bound)
        params.append((w, b))
    return params


def _ref_mlp(x, params, final_relu=True):
    n = len(params)
    for idx, (w, b) in enumerate(params):
        x = x @ w.T + b
        if idx < n - 1 or final_relu:
            x = jnp.maximum(x, 0.0)
    return x


if __name__ == "__main__":
    key = jax.random.PRNGKey(0)
    k_ef, k_el, k_p1, k_p2, k_ef2, k_el2 = jax.random.split(key, 6)

    G_A_L_S = [32, 32, 1]    # attn_fc layer sizes
    G_A_L_S2 = [16, 16, 1]   # attn_fc_lang layer sizes
    attn_params = init_mlp_params(k_p1, G_A_L_S)
    attn_lang_params = init_mlp_params(k_p2, G_A_L_S2)

    # --- case 1: small edge count, single full block ---
    E = 77
    e_f = jax.random.normal(k_ef, (E, G_A_L_S[0]), jnp.float32)
    e_f_lang = jax.random.normal(k_el, (E, G_A_L_S2[0]), jnp.float32)
    out = e_attention_module1_forward(e_f, e_f_lang, attn_params, attn_lang_params)
    jax.block_until_ready(out)
    ref_a = _ref_mlp(e_f, attn_params)
    ref_l = _ref_mlp(e_f_lang, attn_lang_params)
    assert out["a_feat"].shape == (E, 1) and out["a_feat_lang"].shape == (E, 1)
    assert jnp.allclose(out["a_feat"], ref_a, atol=1e-5)
    assert jnp.allclose(out["a_feat_lang"], ref_l, atol=1e-5)

    # --- case 2: multi-tile grid with a ragged last block ---
    E2 = 2500
    e_f2 = jax.random.normal(k_ef2, (E2, G_A_L_S[0]), jnp.float32)
    e_f_lang2 = jax.random.normal(k_el2, (E2, G_A_L_S2[0]), jnp.float32)
    out2 = e_attention_module1_forward(e_f2, e_f_lang2, attn_params, attn_lang_params)
    jax.block_until_ready(out2)
    ref_a2 = _ref_mlp(e_f2, attn_params)
    ref_l2 = _ref_mlp(e_f_lang2, attn_lang_params)
    assert out2["a_feat"].shape == (E2, 1) and out2["a_feat_lang"].shape == (E2, 1)
    assert jnp.allclose(out2["a_feat"], ref_a2, atol=1e-5)
    assert jnp.allclose(out2["a_feat_lang"], ref_l2, atol=1e-5)

    print("KERNEL_OK")
</pallas_src>

<mosaic_0001>
module attributes {stable_mosaic.version = 11 : i64} {
  func.func @_fused_attn_kernel(%arg0: i32, %arg1: memref<77x32xf32, #tpu.memory_space<vmem>>, %arg2: memref<77x16xf32, #tpu.memory_space<vmem>>, %arg3: memref<32x32xf32, #tpu.memory_space<vmem>>, %arg4: memref<32x2xf32, #tpu.memory_space<vmem>>, %arg5: memref<16x16xf32, #tpu.memory_space<vmem>>, %arg6: memref<16x2xf32, #tpu.memory_space<vmem>>, %arg7: memref<2xf32, #tpu.memory_space<smem>>, %arg8: memref<2x77xf32, #tpu.memory_space<vmem>>) attributes {dimension_semantics = [#tpu.dimension_semantics<parallel>], iteration_bounds = array<i64: 1>, scalar_prefetch = 0 : i64, scratch_operands = 0 : i64, tpu.core_type = #tpu.core_type<tc>, window_params = [{transform_indices = @transform_0, window_bounds = array<i64: 77, 32>}, {transform_indices = @transform_1, window_bounds = array<i64: 77, 16>}, {pipeline_mode = #tpu.pipeline_mode<synchronous>, transform_indices = @transform_2, window_bounds = array<i64: 32, 32>}, {pipeline_mode = #tpu.pipeline_mode<synchronous>, transform_indices = @transform_3, window_bounds = array<i64: 32, 2>}, {pipeline_mode = #tpu.pipeline_mode<synchronous>, transform_indices = @transform_4, window_bounds = array<i64: 16, 16>}, {pipeline_mode = #tpu.pipeline_mode<synchronous>, transform_indices = @transform_5, window_bounds = array<i64: 16, 2>}, {transform_indices = @transform_6, window_bounds = array<i64: 2>}, {transform_indices = @transform_7, window_bounds = array<i64: 2, 77>}]} {
    %c0 = arith.constant 0 : index
    %c0_0 = arith.constant 0 : index
    %0 = vector.load %arg4[%c0, %c0_0] : memref<32x2xf32, #tpu.memory_space<vmem>>, vector<32x2xf32>
    %c0_1 = arith.constant 0 : index
    %c0_2 = arith.constant 0 : index
    %1 = vector.load %arg3[%c0_1, %c0_2] : memref<32x32xf32, #tpu.memory_space<vmem>>, vector<32x32xf32>
    %c0_3 = arith.constant 0 : index
    %c0_4 = arith.constant 0 : index
    %2 = vector.load %arg1[%c0_3, %c0_4] : memref<77x32xf32, #tpu.memory_space<vmem>>, vector<77x32xf32>
    %cst = arith.constant dense<0.000000e+00> : vector<32x77xf32>
    %3 = tpu.matmul %1, %2, %cst {dimension_numbers = #tpu.dot_dimension_numbers<[1], [1], [0], [0], [0, 0, 1, 0], [], []>} : vector<32x32xf32>, vector<77x32xf32>, vector<32x77xf32> -> vector<32x77xf32>
    %4 = vector.extract_strided_slice %0 {offsets = [0, 0], sizes = [32, 1], strides = [1, 1]} : vector<32x2xf32> to vector<32x1xf32>
    %5 = vector.broadcast %4 : vector<32x1xf32> to vector<32x77xf32>
    %6 = arith.addf %3, %5 : vector<32x77xf32>
    %cst_5 = arith.constant 0.000000e+00 : f32
    %7 = vector.broadcast %cst_5 : f32 to vector<32x77xf32>
    %8 = arith.maximumf %6, %7 : vector<32x77xf32>
    %9 = vector.extract_strided_slice %0 {offsets = [0, 1], sizes = [32, 1], strides = [1, 1]} : vector<32x2xf32> to vector<32x1xf32>
    %10 = vector.broadcast %9 : vector<32x1xf32> to vector<32x77xf32>
    %11 = arith.mulf %8, %10 : vector<32x77xf32>
    %cst_6 = arith.constant dense<0.000000e+00> : vector<77xf32>
    %12 = vector.multi_reduction <add>, %11, %cst_6 [0] : vector<32x77xf32> to vector<77xf32>
    %13 = vector.shape_cast %12 : vector<77xf32> to vector<1x77xf32>
    %c0_7 = arith.constant 0 : index
    %14 = memref.load %arg7[%c0_7] : memref<2xf32, #tpu.memory_space<smem>>
    %15 = vector.broadcast %14 : f32 to vector<1x77xf32>
    %16 = arith.addf %13, %15 : vector<1x77xf32>
    %c0_8 = arith.constant 0 : index
    %c0_9 = arith.constant 0 : index
    %17 = vector.load %arg6[%c0_8, %c0_9] : memref<16x2xf32, #tpu.memory_space<vmem>>, vector<16x2xf32>
    %c0_10 = arith.constant 0 : index
    %c0_11 = arith.constant 0 : index
    %18 = vector.load %arg5[%c0_10, %c0_11] : memref<16x16xf32, #tpu.memory_space<vmem>>, vector<16x16xf32>
    %c0_12 = arith.constant 0 : index
    %c0_13 = arith.constant 0 : index
    %19 = vector.load %arg2[%c0_12, %c0_13] : memref<77x16xf32, #tpu.memory_space<vmem>>, vector<77x16xf32>
    %cst_14 = arith.constant dense<0.000000e+00> : vector<16x77xf32>
    %20 = tpu.matmul %18, %19, %cst_14 {dimension_numbers = #tpu.dot_dimension_numbers<[1], [1], [0], [0], [0, 0, 1, 0], [], []>} : vector<16x16xf32>, vector<77x16xf32>, vector<16x77xf32> -> vector<16x77xf32>
    %21 = vector.extract_strided_slice %17 {offsets = [0, 0], sizes = [16, 1], strides = [1, 1]} : vector<16x2xf32> to vector<16x1xf32>
    %22 = vector.broadcast %21 : vector<16x1xf32> to vector<16x77xf32>
    %23 = arith.addf %20, %22 : vector<16x77xf32>
    %cst_15 = arith.constant 0.000000e+00 : f32
    %24 = vector.broadcast %cst_15 : f32 to vector<16x77xf32>
    %25 = arith.maximumf %23, %24 : vector<16x77xf32>
    %26 = vector.extract_strided_slice %17 {offsets = [0, 1], sizes = [16, 1], strides = [1, 1]} : vector<16x2xf32> to vector<16x1xf32>
    %27 = vector.broadcast %26 : vector<16x1xf32> to vector<16x77xf32>
    %28 = arith.mulf %25, %27 : vector<16x77xf32>
    %cst_16 = arith.constant dense<0.000000e+00> : vector<77xf32>
    %29 = vector.multi_reduction <add>, %28, %cst_16 [0] : vector<16x77xf32> to vector<77xf32>
    %30 = vector.shape_cast %29 : vector<77xf32> to vector<1x77xf32>
    %c1 = arith.constant 1 : index
    %31 = memref.load %arg7[%c1] : memref<2xf32, #tpu.memory_space<smem>>
    %32 = vector.broadcast %31 : f32 to vector<1x77xf32>
    %33 = arith.addf %30, %32 : vector<1x77xf32>
    %cst_17 = arith.constant 0.000000e+00 : f32
    %34 = vector.broadcast %cst_17 : f32 to vector<1x77xf32>
    %35 = arith.maximumf %16, %34 : vector<1x77xf32>
    %cst_18 = arith.constant 0.000000e+00 : f32
    %36 = vector.broadcast %cst_18 : f32 to vector<1x77xf32>
    %37 = arith.maximumf %33, %36 : vector<1x77xf32>
    %38 = tpu.concatenate %35, %37 in 0 : vector<1x77xf32>, vector<1x77xf32> -> vector<2x77xf32>
    %c0_19 = arith.constant 0 : index
    %c0_20 = arith.constant 0 : index
    %39 = vector.load %arg8[%c0_19, %c0_20] : memref<2x77xf32, #tpu.memory_space<vmem>>, vector<2x77xf32>
    tpu.vector_store %arg8[%c0_19, %c0_20], %38 {strides = array<i32>} : memref<2x77xf32, #tpu.memory_space<vmem>>, vector<2x77xf32>,
    return
  }
  func.func @transform_0(%arg0: i32) -> (i32, i32) {
    %c0_i32 = arith.constant 0 : i32
    %c0_i32_0 = arith.constant 0 : i32
    return %arg0, %c0_i32 : i32, i32
  }
  func.func @transform_1(%arg0: i32) -> (i32, i32) {
    %c0_i32 = arith.constant 0 : i32
    %c0_i32_0 = arith.constant 0 : i32
    return %arg0, %c0_i32 : i32, i32
  }
  func.func @transform_2(%arg0: i32) -> (i32, i32) {
    %c0_i32 = arith.constant 0 : i32
    %c0_i32_0 = arith.constant 0 : i32
    %c0_i32_1 = arith.constant 0 : i32
    return %c0_i32, %c0_i32_0 : i32, i32
  }
  func.func @transform_3(%arg0: i32) -> (i32, i32) {
    %c0_i32 = arith.constant 0 : i32
    %c0_i32_0 = arith.constant 0 : i32
    %c0_i32_1 = arith.constant 0 : i32
    return %c0_i32, %c0_i32_0 : i32, i32
  }
  func.func @transform_4(%arg0: i32) -> (i32, i32) {
    %c0_i32 = arith.constant 0 : i32
    %c0_i32_0 = arith.constant 0 : i32
    %c0_i32_1 = arith.constant 0 : i32
    return %c0_i32, %c0_i32_0 : i32, i32
  }
  func.func @transform_5(%arg0: i32) -> (i32, i32) {
    %c0_i32 = arith.constant 0 : i32
    %c0_i32_0 = arith.constant 0 : i32
    %c0_i32_1 = arith.constant 0 : i32
    return %c0_i32, %c0_i32_0 : i32, i32
  }
  func.func @transform_6(%arg0: i32) -> i32 {
    %c0_i32 = arith.constant 0 : i32
    %c0_i32_0 = arith.constant 0 : i32
    return %c0_i32 : i32
  }
  func.func @transform_7(%arg0: i32) -> (i32, i32) {
    %c0_i32 = arith.constant 0 : i32
    %c0_i32_0 = arith.constant 0 : i32
    return %c0_i32, %arg0 : i32, i32
  }
}

</mosaic_0001>

<bundles_post_ra>
// kernel: tpu_custom_call.1
= control target key start
LH: loop header
LB: loop body
LE: loop exit
PB: predicated region body
PF: predicated region fallthrough
CT: control target
= control target key end

     0   :  { %12 = vsyncpa [#allocation4], 0  ;;  %s774_s0 = inlined_call_operand.vmem [shape: f32[77,32], index: 0, kind: input, shape index: {}]   ;;  %s775_s1 = inlined_call_operand.vmem [shape: f32[77,16], index: 1, kind: input, shape index: {}]   ;;  %s776_s2 = inlined_call_operand.vmem [shape: f32[32,32], index: 2, kind: input, shape index: {}]   ;;  %s777_s3 = inlined_call_operand.vmem [shape: f32[32,2], index: 3, kind: input, shape index: {}]   ;;  %s778_s4 = inlined_call_operand.vmem [shape: f32[16,16], index: 4, kind: input, shape index: {}]   ;;  %s779_s5 = inlined_call_operand.vmem [shape: f32[16,2], index: 5, kind: input, shape index: {}]   ;;  %s780_s6 = inlined_call_operand.vmem [shape: f32[2], index: 6, kind: input, shape index: {}]   ;;  %s781_s7 = inlined_call_operand.hbm [shape: f32[2,77], index: 7, kind: output, shape index: {}]  }
   0x1   :  { %13 = vsyncpa [#allocation3], 0  ;;  %s32_s26 = sshll.u32 %s780_s6, 4  ;;  %s33_s26 = int_to_ptr.vmem [resolvable:$true] %s32_s26 }
   0x2   :  { %s540_s27 = scalar_lea.vmem %s33_s26, 16  ;;  %p545_p1 = scmp.lt.s32.totalorder %s33_s26, %s33_s26 }
   0x3   :  { %p541_p0 = scmp.ne.s32.totalorder %s33_s26, %s540_s27  ;;  %p546_p2 = scmp.lt.s32.totalorder %s540_s27, %s540_s27 }
   0x5   :  { %p547_p3 = por %p546_p2, %p545_p1 }
   0x7   :  { %p548_p4 = pnand %p547_p3, %p541_p0 }
   0x9   :  { %551 = shalt.err (!%p548_p4)
}
   0xa   :  { %s576_s28 = smov [#allocation2]  }
   0xb   :  { %35 = dma.vmem_to_smem %s33_s26, 16, %s576_s28, [#allocation4]  }
   0xc   :  { %572 = dma.done.wait [#allocation4], 16  }
   0xd   :  { %573 = vsyncadd [#allocation4], 4294967280 }
   0xe   :  { %39 = sfence }
   0xf   :  { %v57_v0 = vld [vmem:[%s774_s0 + $0x48] sm:$0x1f]  ;;  %vm78_vm0 = vcmask 261120   ;;  %vm271_vm1 = vcmask 130048   ;;  %v56_v2 = vld [vmem:[%s774_s0 + $0x40] sm:$0xff]  ;;  %v55_v4 = vld [vmem:[%s774_s0 + $0x38] sm:$0xff] }
  0x10   :  { %v260_v1 = vld [vmem:[%s775_s1 + $0x48] sm:$0x1f]  ;;  %481 = vmatprep.subr.msk.mxu0 %vm78_vm0, %v57_v0  ;;  %v259_v3 = vld [vmem:[%s775_s1 + $0x40] sm:$0xff]  ;;  %v258_v5 = vld [vmem:[%s775_s1 + $0x38] sm:$0xff]  ;;  %v577_v6 = vmov 0   ;;  %v578_v22 = vmov 1  }
  0x11   :  { %507 = vmatprep.subr.msk.mxu1 %vm271_vm1, %v260_v1  ;;  %482 = vmatpush3.xpose.msk.msra.mxu0 %vm78_vm0, %v57_v0  ;;  %v44_v7 = vld [vmem:[%s776_s2] sm:$0xff]  ;;  %v54_v9 = vld [vmem:[%s774_s0 + $0x30] sm:$0xff]  ;;  %v53_v13 = vld [vmem:[%s774_s0 + $0x28] sm:$0xff]  ;;  %vm230_vm2 = vcmask 629760   ;;  %s579_s17 = smov [#allocation5]   ;;  %vm409_vm3 = vcmask 1040384  }
  0x12   :  { %508 = vmatpush3.xpose.msk.msra.mxu1 %vm271_vm1, %v260_v1  ;;  %483 = vmatprep.subr.msk.mxu0 %vm78_vm0, %v56_v2  ;;  %v249_v8 = vld [vmem:[%s778_s4] sm:$0xff]  ;;  %v257_v10 = vld [vmem:[%s775_s1 + $0x30] sm:$0xff]  ;;  %v256_v14 = vld [vmem:[%s775_s1 + $0x28] sm:$0xff]  ;;  %s419_s18 = sshll.u32 %s579_s17, 4  ;;  %vm411_vm4 = vcmask 623616   ;;  %s420_s18 = int_to_ptr.vmem [resolvable:$true] %s419_s18 }
  0x13   :  { %509 = vmatprep.subr.msk.mxu1 %vm271_vm1, %v259_v3  ;;  %535 = vset.pattern.permute.xlu1 %v577_v6  ;;  %v42_v11 = vld [vmem:[%s777_s3 + $0x10] sm:$0xff]  ;;  %v40_v12 = vld [vmem:[%s777_s3] sm:$0xff]  ;;  %v43_v15 = vld [vmem:[%s777_s3 + $0x18] sm:$0xff]  ;;  %p557_p6 = scmp.lt.s32.totalorder %s420_s18, %s420_s18 }
  0x14   :  { %534 = vset.pattern.permute.xlu0 %v577_v6  ;;  %501 = vmatprep.mubr.msk.f32.mxu0 %vm78_vm0, %v44_v7  ;;  %v41_v16 = vld [vmem:[%s777_s3 + $0x8] sm:$0xff]  ;;  %v52_v17 = vld [vmem:[%s774_s0 + $0x20] sm:$0xff]  ;;  %v51_v20 = vld [vmem:[%s774_s0 + $0x18] sm:$0xff]  ;;  %s552_s3 = scalar_lea.vmem %s420_s18, 32 }
  0x15   :  { %484 = vmatpush3.xpose.msk.msra.mxu0 %vm78_vm0, %v56_v2  ;;  %527 = vmatprep.mubr.msk.f32.mxu1 %vm271_vm1, %v249_v8  ;;  %v255_v18 = vld [vmem:[%s775_s1 + $0x20] sm:$0xff]  ;;  %v248_v19 = vld [vmem:[%s779_s5 + $0x8] sm:$0xff]  ;;  %v254_v21 = vld [vmem:[%s775_s1 + $0x18] sm:$0xff]  ;;  %p553_p5 = scmp.ne.s32.totalorder %s420_s18, %s552_s3  ;;  %p558_p7 = scmp.lt.s32.totalorder %s552_s3, %s552_s3 }
  0x16   :  { %510 = vmatpush3.xpose.msk.msra.mxu1 %vm271_vm1, %v259_v3  ;;  %485 = vmatprep.subr.msk.mxu0 %vm78_vm0, %v55_v4  ;;  %v50_v23 = vld [vmem:[%s774_s0 + $0x10] sm:$0xff]  ;;  %v247_v25 = vld [vmem:[%s779_s5] sm:$0xff]  ;;  %v49_v26 = vld [vmem:[%s774_s0 + $0x8] sm:$0xff] }
  0x17   :  { %511 = vmatprep.subr.msk.mxu1 %vm271_vm1, %v258_v5  ;;  %70 = vperm.xlu1 %535, %v42_v11   ;;  %v253_v24 = vld [vmem:[%s775_s1 + $0x10] sm:$0xff]  ;;  %v252_v27 = vld [vmem:[%s775_s1 + $0x8] sm:$0xff]  ;;  %v48_v28 = vld [vmem:[%s774_s0] sm:$0xff]  ;;  %p559_p8 = por %p558_p7, %p557_p6 }
  0x18   :  { %60 = vperm.xlu0 %534, %v40_v12   ;;  %v251_v29 = vld [vmem:[%s775_s1] sm:$0xff]  ;;  %v45_v30 = vld [vmem:[%s776_s2 + $0x8] sm:$0xff]  ;;  %v46_v32 = vld [vmem:[%s776_s2 + $0x10] sm:$0xff] }
  0x19   :  { %486 = vmatpush3.xpose.msk.msra.mxu0 %vm78_vm0, %v55_v4  ;;  %v250_v31 = vld [vmem:[%s778_s4 + $0x8] sm:$0xff]  ;;  %v47_v33 = vld [vmem:[%s776_s2 + $0x18] sm:$0xff]  ;;  %s454_s2 = sld [smem:[#allocation2 + $0x1]]  ;;  %p560_p9 = pnand %p559_p8, %p553_p5 }
  0x1a   :  { %512 = vmatpush3.xpose.msk.msra.mxu1 %vm271_vm1, %v258_v5  ;;  %487 = vmatprep.subr.msk.mxu0 %vm78_vm0, %v54_v9  ;;  %s244_s4 = sld [smem:[#allocation2]] }
  0x1b   :  { %513 = vmatprep.subr.msk.mxu1 %vm271_vm1, %v257_v10  ;;  %75 = vperm.xlu1 %535, %v43_v15  }
  0x1c   :  { %65 = vperm.xlu0 %534, %v41_v16  }
  0x1d   :  { %488 = vmatpush3.xpose.msk.msra.mxu0 %vm78_vm0, %v54_v9 }
  0x1e   :  { %514 = vmatpush3.xpose.msk.msra.mxu1 %vm271_vm1, %v257_v10  ;;  %489 = vmatprep.subr.msk.mxu0 %vm78_vm0, %v53_v13 }
  0x1f   :  { %515 = vmatprep.subr.msk.mxu1 %vm271_vm1, %v256_v14  ;;  %536 = vset.pattern.permute.xlu1 %v578_v22 }
  0x20   :  { %268 = vperm.xlu0 %534, %v248_v19   ;;  %215 = vperm.xlu1 %536, %v41_v16  }
  0x21   :  { %490 = vmatpush3.xpose.msk.msra.mxu0 %vm78_vm0, %v53_v13 }
  0x22   :  { %516 = vmatpush3.xpose.msk.msra.mxu1 %vm271_vm1, %v256_v14  ;;  %491 = vmatprep.subr.msk.mxu0 %vm78_vm0, %v52_v17 }
  0x23   :  { %517 = vmatprep.subr.msk.mxu1 %vm271_vm1, %v255_v18 }
  0x24   :  { %538 = vset.pattern.permute.xlu0 %v578_v22  ;;  %537 = vset.pattern.permute.xlu1 %v577_v6 }
  0x25   :  { %492 = vmatpush3.xpose.msk.msra.mxu0 %vm78_vm0, %v52_v17  ;;  %211 = vperm.xlu0 %538, %v40_v12  }
  0x26   :  { %518 = vmatpush3.xpose.msk.msra.mxu1 %vm271_vm1, %v255_v18  ;;  %493 = vmatprep.subr.msk.mxu0 %vm78_vm0, %v51_v20 }
  0x27   :  { %519 = vmatprep.subr.msk.mxu1 %vm271_vm1, %v254_v21  ;;  %263 = vperm.xlu1 %537, %v247_v25  }
  0x29   :  { %494 = vmatpush3.xpose.msk.msra.mxu0 %vm78_vm0, %v51_v20  ;;  %386 = vperm.xlu0 %538, %v247_v25  }
  0x2a   :  { %520 = vmatpush3.xpose.msk.msra.mxu1 %vm271_vm1, %v254_v21  ;;  %495 = vmatprep.subr.msk.mxu0 %vm78_vm0, %v50_v23 }
  0x2b   :  { %521 = vmatprep.subr.msk.mxu1 %vm271_vm1, %v253_v24  ;;  %539 = vset.pattern.permute.xlu1 %v578_v22 }
  0x2c   :  { %219 = vperm.xlu1 %539, %v42_v11  }
  0x2d   :  { %496 = vmatpush3.xpose.msk.msra.mxu0 %vm78_vm0, %v50_v23 }
  0x2e   :  { %522 = vmatpush3.xpose.msk.msra.mxu1 %vm271_vm1, %v253_v24  ;;  %497 = vmatprep.subr.msk.mxu0 %vm78_vm0, %v49_v26 }
  0x2f   :  { %523 = vmatprep.subr.msk.mxu1 %vm271_vm1, %v252_v27 }
  0x30   :  { %223 = vperm.xlu1 %539, %v43_v15  }
  0x31   :  { %498 = vmatpush3.xpose.msk.msra.mxu0 %vm78_vm0, %v49_v26  ;;  %v405_v26 = vstv %s454_s2 }
  0x32   :  { %524 = vmatpush3.xpose.msk.msra.mxu1 %vm271_vm1, %v252_v27  ;;  %499 = vmatprep.subr.msk.mxu0 %vm78_vm0, %v48_v28 }
  0x33   :  { %525 = vmatprep.subr.msk.mxu1 %vm271_vm1, %v251_v29 }
  0x34   :  { %390 = vperm.xlu1 %539, %v248_v19  }
  0x35   :  { %500 = vmatpush3.xpose.msk.msra.mxu0 %vm78_vm0, %v48_v28  ;;  %v245_v28 = vstv %s244_s4 }
  0x36   :  { %526 = vmatpush3.xpose.msk.msra.mxu1 %vm271_vm1, %v251_v29 }
  0x38   :  { %502 = vmatmul.mubr.msk.f32.vlgmr.msra.gmra.mxu0 %vm78_vm0, %v45_v30 }
  0x39   :  { %528 = vmatmul.mubr.msk.f32.vlgmr.msra.gmra.mxu1 %vm271_vm1, %v250_v31  ;;  %504 = vmatprep.mubr.msk.f32.mxu0 %vm78_vm0, %v46_v32 }
  0x3c   :  { %505 = vmatmul.mubr.msk.f32.gmra.mxu0 %vm78_vm0, %v47_v33 }
  0x92   :  { %v71_v34 = vpop.permute.xlu1 %70 }
  0x93   :  { %v61_v37 = vpop.permute.xlu0 %60 }
  0x96   :  { %v76_v35 = vpop.permute.xlu1 %75 }
  0x97   :  { %v66_v39 = vpop.permute.xlu0 %65 }
  0x9b   :  { %v216_v36 = vpop.permute.xlu1 %215  ;;  %v269_v41 = vpop.permute.xlu0 %268 }
  0xa0   :  { %v212_v43 = vpop.permute.xlu0 %211 }
  0xa2   :  { %v264_v38 = vpop.permute.xlu1 %263 }
  0xa4   :  { %v387_v59 = vpop.permute.xlu0 %386 }
  0xa7   :  { %v220_v40 = vpop.permute.xlu1 %219 }
  0xab   :  { %v224_v42 = vpop.permute.xlu1 %223 }
  0xaf   :  { %v391_v54 = vpop.permute.xlu1 %390 }
  0xf8   :  { %v503_v44 = vpop.f32.mrf.mxu0 }
  0xf9   :  { %v529_v45 = vpop.f32.mrf.mxu1  ;;  %v193_v46 = vadd.f32 %v503_v44, %v66_v39 }
  0xfa   :  { %v380_v47 = vadd.f32 %v529_v45, %v269_v41  ;;  %v187_v48 = vpop.f32.mrf.mxu0 }
  0xfb   :  { %v374_v49 = vpop.f32.mrf.mxu1  ;;  %v207_v50 = vmax.f32 %v193_v46, 0.0  ;;  %v188_v52 = vadd.f32 %v187_v48, %v61_v37 }
  0xfc   :  { %v384_v51 = vmax.f32 %v380_v47, 0.0  ;;  %v375_v53 = vadd.f32 %v374_v49, %v264_v38  ;;  %v506_v55 = vpop.f32.mrf.mxu0 }
  0xfd   :  { %v206_v56 = vmax.f32 %v188_v52, 0.0  ;;  %v203_v58 = vadd.f32 %v506_v55, %v76_v35  ;;  %v227_v62 = vmul.f32 %v216_v36, %v207_v50 }
  0xfe   :  { %v383_v57 = vmax.f32 %v375_v53, 0.0  ;;  %v394_v60 = vmul.f32 %v391_v54, %v384_v51  ;;  %v197_v61 = vpop.f32.mrf.mxu0 }
  0xff   :  { %v226_v63 = vmul.f32 %v212_v43, %v206_v56  ;;  %v209_v0 = vmax.f32 %v203_v58, 0.0  ;;  %v198_v1 = vadd.f32 %v197_v61, %v71_v34  ;;  %v232_v7 = vsel %vm230_vm2, %v227_v62, 0.0 }
 0x100   :  { %v393_v2 = vmul.f32 %v387_v59, %v383_v57  ;;  %v396_v5 = vsel %vm230_vm2, %v394_v60, 0.0 }
 0x101   :  { %v231_v3 = vsel %vm230_vm2, %v226_v63, 0.0  ;;  %v208_v4 = vmax.f32 %v198_v1, 0.0  ;;  %v229_v8 = vmul.f32 %v224_v42, %v209_v0 }
 0x102   :  { %v395_v6 = vsel %vm230_vm2, %v393_v2, 0.0  ;;  %v233_v11 = vadd.f32 %v232_v7, %v231_v3 }
 0x103   :  { %v228_v9 = vmul.f32 %v220_v40, %v208_v4  ;;  %v397_v10 = vadd.f32 %v396_v5, %v395_v6  ;;  %v236_v15 = vsel %vm230_vm2, %v229_v8, 0.0 }
 0x105   :  { %v234_v12 = vsel %vm230_vm2, %v228_v9, 0.0  ;;  %v398_v13 = vrot.slane %v397_v10, 4 }
 0x106   :  { %v235_v14 = vadd.f32 %v234_v12, %v233_v11 }
 0x107   :  { %v399_v16 = vadd.f32 %v398_v13, %v397_v10 }
 0x108   :  { %v237_v17 = vadd.f32 %v236_v15, %v235_v14 }
 0x109   :  { %v400_v18 = vrot.slane %v399_v16, 2 }
 0x10a   :  { %v238_v19 = vrot.slane %v237_v17, 4 }
 0x10b   :  { %v401_v20 = vadd.f32 %v400_v18, %v399_v16 }
 0x10c   :  { %v239_v21 = vadd.f32 %v238_v19, %v237_v17 }
 0x10d   :  { %v402_v22 = vrot.slane %v401_v20, 1 }
 0x10e   :  { %v240_v23 = vrot.slane %v239_v21, 2 }
 0x10f   :  { %v403_v25 = vadd.f32 %v402_v22, %v401_v20 }
 0x110   :  { %v241_v24 = vadd.f32 %v240_v23, %v239_v21 }
 0x111   :  { %v406_v30 = vadd.f32 %v405_v26, %v403_v25 }
 0x112   :  { %v242_v27 = vrot.slane %v241_v24, 1 }
 0x113   :  { %v408_v33 = vmax.f32 %v406_v30, 0.0 }
 0x114   :  { %v243_v29 = vadd.f32 %v242_v27, %v241_v24 }
 0x116   :  { %v246_v31 = vadd.f32 %v245_v28, %v243_v29 }
 0x118   :  { %v407_v32 = vmax.f32 %v246_v31, 0.0 }
 0x11a   :  { %v410_v34 = vsel %vm409_vm3, %v407_v32, %v408_v33 }
 0x11b   :  { %412 = vst.msk [vmem:[#allocation5] sm:$0x3] %vm411_vm4, %v410_v34 }
 0x11c   :  { %563 = shalt.err (!%p560_p9)
}
 0x11d   :  { %422 = dma.vmem_to_hbm [thread:$0]  %s420_s18, 32, %s781_s7, [#allocation3]  }
 0x11e   :  { %574 = dma.done.wait [#allocation3], 32  }
 0x11f   :  { %575 = vsyncadd [#allocation3], 4294967264 }
 0x120   :  { %426 = vsyncpa [#allocation3], 1 }
 0x121   :  { %427 = vsyncpa [#allocation4], 1 }

</bundles_post_ra>
